<compile_context>
chip_gen: v5e
topology: v5e:2x2
jax: 0.10.0
libtpu: 0.0.40
codegen_flags: <defaults>
</compile_context>

<pallas_src>
import numpy as np
import jax
import jax.numpy as jnp
from jax.experimental import pallas as pl
from jax.experimental.pallas import tpu as pltpu


# ----------------------------- Pallas kernel ------------------------------- #

def _ffm_kernel(ustk_ref, low_ref, high_ref, wdw_ref, sdw_ref,
                wlo_ref, slo_ref, whi_ref, shi_ref, out_ref):
    # Per grid step:
    #   ustk_ref : (W*TH, 9*hw) bf16   rows ordered (x, y_local)
    #   low_ref  : (hw, Cl)     f32
    #   high_ref : (W*TH, Ch)   f32    rows ordered (x, y_local)
    #   wdw_ref  : (9, 1, Co)   f32    depthwise taps, BN scale folded
    #   out_ref  : (TH, W*Co)   f32    lane-dense output tile
    hw, cl = low_ref.shape
    th, wco = out_ref.shape
    co = wlo_ref.shape[1]
    w = wco // co

    # Per-tap-scaled RHS: low_scaled[k*hw + q, c] = low[q, c] * wdw[k, c]
    low = low_ref[...]
    low_scaled = (wdw_ref[...] * low[None, :, :]).reshape(9 * hw, cl)
    low_scaled = low_scaled.astype(jnp.bfloat16)

    # Fused bilinear x4 upsample + zero-padded 3x3 depthwise conv:
    # one bf16 MXU matmul, f32 accumulation (K = 9*hw instead of hw).
    acc = jnp.dot(ustk_ref[...], low_scaled, preferred_element_type=jnp.float32)
    dw = jnp.maximum(acc + sdw_ref[...], 0.0)               # DWConv BN + ReLU

    # 1x1 convs (+ folded BN), residual add, ReLU.
    # TODO(synk): fusing the two matmuls into one needs an unaligned minor-dim
    # concat of [dw | high]; kept separate (both tiny) to stay on safe lowerings.
    lo = jnp.dot(dw, wlo_ref[...], preferred_element_type=jnp.float32) + slo_ref[...]
    hi = jnp.dot(high_ref[...], whi_ref[...],
                 preferred_element_type=jnp.float32) + shi_ref[...]
    res = jnp.maximum(lo + hi, 0.0)                         # (W*TH, Co), (x, y) order

    # Lane-dense scatter: out[y, x*Co + c] = res[x*TH + y, c].
    # All slices are static and tile-aligned (TH % 8 == 0).
    for x in range(w):
        out_ref[:, x * co:(x + 1) * co] = res[x * th:(x + 1) * th, :]


# ------------------------------- glue: upsample/tap matrices ---------------- #

def _upsample_matrix_1d(in_size, out_size):
    """Bilinear, align_corners=True interpolation matrix (out_size, in_size)."""
    if out_size == 1:
        src = np.zeros((1,), np.float64)
    else:
        src = np.arange(out_size, dtype=np.float64) * (in_size - 1) / (out_size - 1)
    i0 = np.clip(np.floor(src).astype(np.int64), 0, in_size - 1)
    i1 = np.minimum(i0 + 1, in_size - 1)
    frac = src - i0
    m = np.zeros((out_size, in_size), np.float32)
    m[np.arange(out_size), i0] += (1.0 - frac)
    m[np.arange(out_size), i1] += frac
    return m


def _build_tap_stack(h, w, H, W):
    """(9*H*W, h*w) f32: bilinear upsample followed by the zero-padded shift of
    each 3x3 depthwise tap (tap order ky*3+kx), output pixels row-major."""
    uh = _upsample_matrix_1d(h, H)                                        # (H, h)
    uw = _upsample_matrix_1d(w, W)                                        # (W, w)
    u2 = np.einsum('Hp,Wq->HWpq', uh, uw).reshape(H * W, h * w)           # (H*W, h*w)
    yy = np.arange(H)[:, None]
    xx = np.arange(W)[None, :]
    mats = []
    for ky in range(3):
        for kx in range(3):
            sy = yy + ky - 1
            sx = xx + kx - 1
            valid = (sy >= 0) & (sy < H) & (sx >= 0) & (sx < W)
            src = np.clip(sy, 0, H - 1) * W + np.clip(sx, 0, W - 1)
            mats.append(u2[src.reshape(-1)] * valid.reshape(-1, 1))
    return np.concatenate(mats, axis=0).astype(np.float32)                # (9*H*W, h*w)


def _prepare_kernel_tap_operand(stk, H, W, th):
    """Transpose the (9*HW, hw) stack to (HW, 9*hw), permute rows to per-row-tile
    (x, y_local) order, cast to bf16 (kernel operand)."""
    HW = H * W
    hw = stk.shape[1]
    u_t = stk.reshape(9, HW, hw).transpose(1, 0, 2).reshape(HW, 9 * hw)
    r = H // th
    u_t = u_t.reshape(r, th, W, 9 * hw).transpose(0, 2, 1, 3).reshape(HW, 9 * hw)
    return jnp.asarray(u_t, dtype=jnp.bfloat16)


# ------------------------------- glue: parameters --------------------------- #

def init_params(key, higher_in_channels, lower_in_channels, out_channels, eps=1e-5):
    # torchx.nn.DWConv assumed to be the Fast-SCNN _DWConv:
    #   Conv2d(Cin, Cout, 3, stride, 1, groups=Cin, bias=False) + BN + ReLU
    # TODO(synk): general grouped case (out_channels != lower_in_channels) not handled.
    assert out_channels == lower_in_channels, "depthwise conv assumes Cout == Cin"
    ks = jax.random.split(key, 18)

    def bn(k0, k1, k2, k3, c):
        gamma = 1.0 + 0.1 * jax.random.normal(k0, (c,), jnp.float32)
        beta = 0.1 * jax.random.normal(k1, (c,), jnp.float32)
        mean = 0.1 * jax.random.normal(k2, (c,), jnp.float32)
        var = 0.5 + jax.random.uniform(k3, (c,), jnp.float32)
        scale = gamma / jnp.sqrt(var + eps)
        shift = beta - scale * mean
        return scale, shift

    C = out_channels
    # DWConv: depthwise 3x3 weights (C, 3, 3), no bias, + BN + ReLU
    w_dw = 0.3 * jax.random.normal(ks[0], (C, 3, 3), jnp.float32)
    s_dw, sh_dw = bn(ks[1], ks[2], ks[3], ks[4], C)
    wdw = (w_dw * s_dw[:, None, None]).transpose(1, 2, 0).reshape(9, C)   # (9, C), tap-major
    sdw = sh_dw.reshape(1, C)

    # conv_lower_res: Conv2d(C, C, 1) (bias) + BN
    w_lo = 0.3 * jax.random.normal(ks[5], (C, C), jnp.float32)            # (Cout, Cin)
    b_lo = 0.1 * jax.random.normal(ks[6], (C,), jnp.float32)
    s_lo, sh_lo = bn(ks[7], ks[8], ks[9], ks[10], C)
    wlo = (w_lo * s_lo[:, None]).T                                        # (Cin, Cout)
    slo = (s_lo * b_lo + sh_lo).reshape(1, C)

    # conv_higher_res: Conv2d(Ch, C, 1) (bias) + BN
    w_hi = 0.3 * jax.random.normal(ks[11], (C, higher_in_channels), jnp.float32)
    b_hi = 0.1 * jax.random.normal(ks[12], (C,), jnp.float32)
    s_hi, sh_hi = bn(ks[13], ks[14], ks[15], ks[16], C)
    whi = (w_hi * s_hi[:, None]).T                                        # (Ch, Cout)
    shi = (s_hi * b_hi + sh_hi).reshape(1, C)

    return dict(wdw=wdw, sdw=sdw, wlo=wlo, slo=slo, whi=whi, shi=shi)


# ------------------------------- wrapper ------------------------------------ #

def feature_fusion_module(higher_nchw, lower_nchw, ustk_t, params, *,
                          scale_factor=4, row_tile=8):
    N, Ch, H, W = higher_nchw.shape
    _, Cl, h, w = lower_nchw.shape
    Co = params['wlo'].shape[1]
    TH = row_tile
    assert H == h * scale_factor and W == w * scale_factor
    assert H % TH == 0 and TH % 8 == 0, "row tile must be a multiple of 8 sublanes"
    assert (h * w) % 8 == 0, "hw must be sublane-aligned for the RHS reshape"
    R = H // TH
    hw = h * w
    assert ustk_t.shape == (H * W, 9 * hw)

    # NHWC flatten; higher-res rows permuted to per-row-tile (x, y_local) order so
    # the kernel's lane-dense output scatter uses tile-aligned static slices.
    low_f = jnp.transpose(lower_nchw, (0, 2, 3, 1)).reshape(N, hw, Cl)
    high_f = jnp.transpose(higher_nchw, (0, 2, 3, 1))                     # (N, H, W, Ch)
    high_f = (high_f.reshape(N, R, TH, W, Ch)
              .transpose(0, 1, 3, 2, 4).reshape(N, H * W, Ch))

    wdw3 = params['wdw'].reshape(9, 1, Co)

    out = pl.pallas_call(
        _ffm_kernel,
        out_shape=jax.ShapeDtypeStruct((N, H, W * Co), jnp.float32),
        grid=(N, R),
        in_specs=[
            pl.BlockSpec((W * TH, 9 * hw), lambda n, r: (r, 0)),      # tap stack (bf16)
            pl.BlockSpec((None, hw, Cl), lambda n, r: (n, 0, 0)),     # lower
            pl.BlockSpec((None, W * TH, Ch), lambda n, r: (n, r, 0)), # higher (permuted)
            pl.BlockSpec((9, 1, Co), lambda n, r: (0, 0, 0)),         # folded dw weights
            pl.BlockSpec((1, Co), lambda n, r: (0, 0)),               # dw BN shift
            pl.BlockSpec((Cl, Co), lambda n, r: (0, 0)),              # folded 1x1 (lower)
            pl.BlockSpec((1, Co), lambda n, r: (0, 0)),
            pl.BlockSpec((Ch, Co), lambda n, r: (0, 0)),              # folded 1x1 (higher)
            pl.BlockSpec((1, Co), lambda n, r: (0, 0)),
        ],
        out_specs=pl.BlockSpec((None, TH, W * Co), lambda n, r: (n, r, 0)),
        compiler_params=pltpu.CompilerParams(
            dimension_semantics=("parallel", "parallel"),
            vmem_limit_bytes=32 * 1024 * 1024),
    )(ustk_t, low_f, high_f, wdw3, params['sdw'],
      params['wlo'], params['slo'], params['whi'], params['shi'])

    return jnp.transpose(out.reshape(N, H, W, Co), (0, 3, 1, 2))          # NCHW


# ------------------------------- reference (pure JAX, glue) ----------------- #

def _reference(higher_nchw, lower_nchw, stk, params):
    N, Ch, H, W = higher_nchw.shape
    _, Cl, h, w = lower_nchw.shape
    HW = H * W
    hp = jax.lax.Precision.HIGHEST
    high_f = jnp.transpose(higher_nchw, (0, 2, 3, 1)).reshape(N, HW, Ch)
    low_f = jnp.transpose(lower_nchw, (0, 2, 3, 1)).reshape(N, h * w, Cl)
    taps = jnp.einsum('Sk,nkc->nSc', stk, low_f, precision=hp)
    acc = sum(taps[:, k * HW:(k + 1) * HW, :] * params['wdw'][k][None, None, :]
              for k in range(9))
    dw = jnp.maximum(acc + params['sdw'][None], 0.0)
    lo = jnp.einsum('nsc,co->nso', dw, params['wlo'], precision=hp) + params['slo'][None]
    hi = jnp.einsum('nsc,co->nso', high_f, params['whi'], precision=hp) + params['shi'][None]
    out = jnp.maximum(lo + hi, 0.0)
    return jnp.transpose(out.reshape(N, H, W, -1), (0, 3, 1, 2))


# ------------------------------- main ---------------------------------------- #

if __name__ == "__main__":
    N = 2
    higher_in_channels, lower_in_channels, out_channels = 6, 8, 8
    scale_factor = 4
    h = w_sp = 4
    H = W = h * scale_factor
    ROW_TILE = 8   # 2 row tiles of (8, W*Co=128) output: exercises the pipelined,
                   # parallel grid even at toy sizes.  For real sizes pick the
                   # largest multiple-of-8 tile that fits VMEM (~half on v7x).

    key = jax.random.PRNGKey(0)
    k_hi, k_lo, k_par = jax.random.split(key, 3)
    higher_res_feature = jax.random.normal(k_hi, (N, higher_in_channels, H, W), jnp.float32)
    lower_res_feature = jax.random.normal(k_lo, (N, lower_in_channels, h, w_sp), jnp.float32)

    params = init_params(k_par, higher_in_channels, lower_in_channels, out_channels)

    stk = _build_tap_stack(h, w_sp, H, W)                         # (9*HW, hw) f32
    ustk_t = _prepare_kernel_tap_operand(stk, H, W, ROW_TILE)     # (HW, 9*hw) bf16

    out = feature_fusion_module(higher_res_feature, lower_res_feature, ustk_t,
                                params, scale_factor=scale_factor, row_tile=ROW_TILE)
    out = jax.block_until_ready(out)

    # Reference uses the bf16-rounded tap weights so the comparison isolates the
    # kernel itself (remaining diff: bf16 RHS cast + MXU bf16 products).
    stk_ref = jnp.asarray(stk, jnp.bfloat16).astype(jnp.float32)
    ref = jax.block_until_ready(
        _reference(higher_res_feature, lower_res_feature, stk_ref, params))
    assert out.shape == (N, out_channels, H, W)
    np.testing.assert_allclose(np.asarray(out), np.asarray(ref), atol=5e-2, rtol=5e-2)

    print("KERNEL_OK")
</pallas_src>

<mosaic_0001>
module attributes {stable_mosaic.version = 11 : i64} {
  func.func @_ffm_kernel(%arg0: i32, %arg1: i32, %arg2: memref<128x144xbf16, #tpu.memory_space<vmem>>, %arg3: memref<1x16x8xf32, #tpu.memory_space<vmem>>, %arg4: memref<1x128x6xf32, #tpu.memory_space<vmem>>, %arg5: memref<9x1x8xf32, #tpu.memory_space<vmem>>, %arg6: memref<1x8xf32, #tpu.memory_space<vmem>>, %arg7: memref<8x8xf32, #tpu.memory_space<vmem>>, %arg8: memref<1x8xf32, #tpu.memory_space<vmem>>, %arg9: memref<6x8xf32, #tpu.memory_space<vmem>>, %arg10: memref<1x8xf32, #tpu.memory_space<vmem>>, %arg11: memref<1x8x128xf32, #tpu.memory_space<vmem>>) attributes {dimension_semantics = [#tpu.dimension_semantics<parallel>, #tpu.dimension_semantics<parallel>], iteration_bounds = array<i64: 2, 2>, scalar_prefetch = 0 : i64, scratch_operands = 0 : i64, tpu.core_type = #tpu.core_type<tc>, window_params = [{transform_indices = @transform_0, window_bounds = array<i64: 128, 144>}, {transform_indices = @transform_1, window_bounds = array<i64: 1, 16, 8>}, {transform_indices = @transform_2, window_bounds = array<i64: 1, 128, 6>}, {pipeline_mode = #tpu.pipeline_mode<synchronous>, transform_indices = @transform_3, window_bounds = array<i64: 9, 1, 8>}, {pipeline_mode = #tpu.pipeline_mode<synchronous>, transform_indices = @transform_4, window_bounds = array<i64: 1, 8>}, {pipeline_mode = #tpu.pipeline_mode<synchronous>, transform_indices = @transform_5, window_bounds = array<i64: 8, 8>}, {pipeline_mode = #tpu.pipeline_mode<synchronous>, transform_indices = @transform_6, window_bounds = array<i64: 1, 8>}, {pipeline_mode = #tpu.pipeline_mode<synchronous>, transform_indices = @transform_7, window_bounds = array<i64: 6, 8>}, {pipeline_mode = #tpu.pipeline_mode<synchronous>, transform_indices = @transform_8, window_bounds = array<i64: 1, 8>}, {transform_indices = @transform_9, window_bounds = array<i64: 1, 8, 128>}]} {
    %c0 = arith.constant 0 : index
    %c0_0 = arith.constant 0 : index
    %c0_1 = arith.constant 0 : index
    %0 = vector.load %arg3[%c0, %c0_0, %c0_1] : memref<1x16x8xf32, #tpu.memory_space<vmem>>, vector<1x16x8xf32>
    %1 = vector.shape_cast %0 : vector<1x16x8xf32> to vector<16x8xf32>
    %c0_2 = arith.constant 0 : index
    %c0_3 = arith.constant 0 : index
    %c0_4 = arith.constant 0 : index
    %2 = vector.load %arg5[%c0_2, %c0_3, %c0_4] : memref<9x1x8xf32, #tpu.memory_space<vmem>>, vector<9x1x8xf32>
    %3 = vector.shape_cast %1 : vector<16x8xf32> to vector<1x16x8xf32>
    %4 = vector.broadcast %2 : vector<9x1x8xf32> to vector<9x16x8xf32>
    %5 = vector.broadcast %3 : vector<1x16x8xf32> to vector<9x16x8xf32>
    %6 = arith.mulf %4, %5 : vector<9x16x8xf32>
    %7 = vector.shape_cast %6 : vector<9x16x8xf32> to vector<144x8xf32>
    %8 = arith.truncf %7 : vector<144x8xf32> to vector<144x8xbf16>
    %c0_5 = arith.constant 0 : index
    %c0_6 = arith.constant 0 : index
    %9 = vector.load %arg2[%c0_5, %c0_6] : memref<128x144xbf16, #tpu.memory_space<vmem>>, vector<128x144xbf16>
    %cst = arith.constant dense<0.000000e+00> : vector<128x8xf32>
    %10 = tpu.matmul %9, %8, %cst {dimension_numbers = #tpu.dot_dimension_numbers<[1], [0], [0], [1], [0, 0, 1, 1], [], []>} : vector<128x144xbf16>, vector<144x8xbf16>, vector<128x8xf32> -> vector<128x8xf32>
    %c0_7 = arith.constant 0 : index
    %c0_8 = arith.constant 0 : index
    %11 = vector.load %arg6[%c0_7, %c0_8] : memref<1x8xf32, #tpu.memory_space<vmem>>, vector<1x8xf32>
    %12 = vector.broadcast %11 : vector<1x8xf32> to vector<128x8xf32>
    %13 = arith.addf %10, %12 : vector<128x8xf32>
    %cst_9 = arith.constant 0.000000e+00 : f32
    %14 = vector.broadcast %cst_9 : f32 to vector<128x8xf32>
    %15 = arith.maximumf %13, %14 : vector<128x8xf32>
    %c0_10 = arith.constant 0 : index
    %c0_11 = arith.constant 0 : index
    %16 = vector.load %arg7[%c0_10, %c0_11] : memref<8x8xf32, #tpu.memory_space<vmem>>, vector<8x8xf32>
    %cst_12 = arith.constant dense<0.000000e+00> : vector<128x8xf32>
    %17 = tpu.matmul %15, %16, %cst_12 {dimension_numbers = #tpu.dot_dimension_numbers<[1], [0], [0], [1], [0, 0, 1, 1], [], []>} : vector<128x8xf32>, vector<8x8xf32>, vector<128x8xf32> -> vector<128x8xf32>
    %c0_13 = arith.constant 0 : index
    %c0_14 = arith.constant 0 : index
    %18 = vector.load %arg8[%c0_13, %c0_14] : memref<1x8xf32, #tpu.memory_space<vmem>>, vector<1x8xf32>
    %19 = vector.broadcast %18 : vector<1x8xf32> to vector<128x8xf32>
    %20 = arith.addf %17, %19 : vector<128x8xf32>
    %c0_15 = arith.constant 0 : index
    %c0_16 = arith.constant 0 : index
    %c0_17 = arith.constant 0 : index
    %21 = vector.load %arg4[%c0_15, %c0_16, %c0_17] : memref<1x128x6xf32, #tpu.memory_space<vmem>>, vector<1x128x6xf32>
    %22 = vector.shape_cast %21 : vector<1x128x6xf32> to vector<128x6xf32>
    %c0_18 = arith.constant 0 : index
    %c0_19 = arith.constant 0 : index
    %23 = vector.load %arg9[%c0_18, %c0_19] : memref<6x8xf32, #tpu.memory_space<vmem>>, vector<6x8xf32>
    %cst_20 = arith.constant dense<0.000000e+00> : vector<128x8xf32>
    %24 = tpu.matmul %22, %23, %cst_20 {dimension_numbers = #tpu.dot_dimension_numbers<[1], [0], [0], [1], [0, 0, 1, 1], [], []>} : vector<128x6xf32>, vector<6x8xf32>, vector<128x8xf32> -> vector<128x8xf32>
    %c0_21 = arith.constant 0 : index
    %c0_22 = arith.constant 0 : index
    %25 = vector.load %arg10[%c0_21, %c0_22] : memref<1x8xf32, #tpu.memory_space<vmem>>, vector<1x8xf32>
    %26 = vector.broadcast %25 : vector<1x8xf32> to vector<128x8xf32>
    %27 = arith.addf %24, %26 : vector<128x8xf32>
    %28 = arith.addf %20, %27 : vector<128x8xf32>
    %cst_23 = arith.constant 0.000000e+00 : f32
    %29 = vector.broadcast %cst_23 : f32 to vector<128x8xf32>
    %30 = arith.maximumf %28, %29 : vector<128x8xf32>
    %31 = vector.extract_strided_slice %30 {offsets = [0, 0], sizes = [8, 8], strides = [1, 1]} : vector<128x8xf32> to vector<8x8xf32>
    %c0_24 = arith.constant 0 : index
    %c0_25 = arith.constant 0 : index
    %c0_26 = arith.constant 0 : index
    %32 = vector.load %arg11[%c0_24, %c0_25, %c0_26] : memref<1x8x128xf32, #tpu.memory_space<vmem>>, vector<1x8x8xf32>
    %33 = vector.shape_cast %32 : vector<1x8x8xf32> to vector<8x8xf32>
    %34 = vector.shape_cast %31 : vector<8x8xf32> to vector<1x8x8xf32>
    tpu.vector_store %arg11[%c0_24, %c0_25, %c0_26], %34 {strides = array<i32>} : memref<1x8x128xf32, #tpu.memory_space<vmem>>, vector<1x8x8xf32>,
    %35 = vector.extract_strided_slice %30 {offsets = [8, 0], sizes = [8, 8], strides = [1, 1]} : vector<128x8xf32> to vector<8x8xf32>
    %c0_27 = arith.constant 0 : index
    %c0_28 = arith.constant 0 : index
    %c8 = arith.constant 8 : index
    %36 = vector.load %arg11[%c0_27, %c0_28, %c8] : memref<1x8x128xf32, #tpu.memory_space<vmem>>, vector<1x8x8xf32>
    %37 = vector.shape_cast %36 : vector<1x8x8xf32> to vector<8x8xf32>
    %38 = vector.shape_cast %35 : vector<8x8xf32> to vector<1x8x8xf32>
    tpu.vector_store %arg11[%c0_27, %c0_28, %c8], %38 {strides = array<i32>} : memref<1x8x128xf32, #tpu.memory_space<vmem>>, vector<1x8x8xf32>,
    %39 = vector.extract_strided_slice %30 {offsets = [16, 0], sizes = [8, 8], strides = [1, 1]} : vector<128x8xf32> to vector<8x8xf32>
    %c0_29 = arith.constant 0 : index
    %c0_30 = arith.constant 0 : index
    %c16 = arith.constant 16 : index
    %40 = vector.load %arg11[%c0_29, %c0_30, %c16] : memref<1x8x128xf32, #tpu.memory_space<vmem>>, vector<1x8x8xf32>
    %41 = vector.shape_cast %40 : vector<1x8x8xf32> to vector<8x8xf32>
    %42 = vector.shape_cast %39 : vector<8x8xf32> to vector<1x8x8xf32>
    tpu.vector_store %arg11[%c0_29, %c0_30, %c16], %42 {strides = array<i32>} : memref<1x8x128xf32, #tpu.memory_space<vmem>>, vector<1x8x8xf32>,
    %43 = vector.extract_strided_slice %30 {offsets = [24, 0], sizes = [8, 8], strides = [1, 1]} : vector<128x8xf32> to vector<8x8xf32>
    %c0_31 = arith.constant 0 : index
    %c0_32 = arith.constant 0 : index
    %c24 = arith.constant 24 : index
    %44 = vector.load %arg11[%c0_31, %c0_32, %c24] : memref<1x8x128xf32, #tpu.memory_space<vmem>>, vector<1x8x8xf32>
    %45 = vector.shape_cast %44 : vector<1x8x8xf32> to vector<8x8xf32>
    %46 = vector.shape_cast %43 : vector<8x8xf32> to vector<1x8x8xf32>
    tpu.vector_store %arg11[%c0_31, %c0_32, %c24], %46 {strides = array<i32>} : memref<1x8x128xf32, #tpu.memory_space<vmem>>, vector<1x8x8xf32>,
    %47 = vector.extract_strided_slice %30 {offsets = [32, 0], sizes = [8, 8], strides = [1, 1]} : vector<128x8xf32> to vector<8x8xf32>
    %c0_33 = arith.constant 0 : index
    %c0_34 = arith.constant 0 : index
    %c32 = arith.constant 32 : index
    %48 = vector.load %arg11[%c0_33, %c0_34, %c32] : memref<1x8x128xf32, #tpu.memory_space<vmem>>, vector<1x8x8xf32>
    %49 = vector.shape_cast %48 : vector<1x8x8xf32> to vector<8x8xf32>
    %50 = vector.shape_cast %47 : vector<8x8xf32> to vector<1x8x8xf32>
    tpu.vector_store %arg11[%c0_33, %c0_34, %c32], %50 {strides = array<i32>} : memref<1x8x128xf32, #tpu.memory_space<vmem>>, vector<1x8x8xf32>,
    %51 = vector.extract_strided_slice %30 {offsets = [40, 0], sizes = [8, 8], strides = [1, 1]} : vector<128x8xf32> to vector<8x8xf32>
    %c0_35 = arith.constant 0 : index
    %c0_36 = arith.constant 0 : index
    %c40 = arith.constant 40 : index
    %52 = vector.load %arg11[%c0_35, %c0_36, %c40] : memref<1x8x128xf32, #tpu.memory_space<vmem>>, vector<1x8x8xf32>
    %53 = vector.shape_cast %52 : vector<1x8x8xf32> to vector<8x8xf32>
    %54 = vector.shape_cast %51 : vector<8x8xf32> to vector<1x8x8xf32>
    tpu.vector_store %arg11[%c0_35, %c0_36, %c40], %54 {strides = array<i32>} : memref<1x8x128xf32, #tpu.memory_space<vmem>>, vector<1x8x8xf32>,
    %55 = vector.extract_strided_slice %30 {offsets = [48, 0], sizes = [8, 8], strides = [1, 1]} : vector<128x8xf32> to vector<8x8xf32>
    %c0_37 = arith.constant 0 : index
    %c0_38 = arith.constant 0 : index
    %c48 = arith.constant 48 : index
    %56 = vector.load %arg11[%c0_37, %c0_38, %c48] : memref<1x8x128xf32, #tpu.memory_space<vmem>>, vector<1x8x8xf32>
    %57 = vector.shape_cast %56 : vector<1x8x8xf32> to vector<8x8xf32>
    %58 = vector.shape_cast %55 : vector<8x8xf32> to vector<1x8x8xf32>
    tpu.vector_store %arg11[%c0_37, %c0_38, %c48], %58 {strides = array<i32>} : memref<1x8x128xf32, #tpu.memory_space<vmem>>, vector<1x8x8xf32>,
    %59 = vector.extract_strided_slice %30 {offsets = [56, 0], sizes = [8, 8], strides = [1, 1]} : vector<128x8xf32> to vector<8x8xf32>
    %c0_39 = arith.constant 0 : index
    %c0_40 = arith.constant 0 : index
    %c56 = arith.constant 56 : index
    %60 = vector.load %arg11[%c0_39, %c0_40, %c56] : memref<1x8x128xf32, #tpu.memory_space<vmem>>, vector<1x8x8xf32>
    %61 = vector.shape_cast %60 : vector<1x8x8xf32> to vector<8x8xf32>
    %62 = vector.shape_cast %59 : vector<8x8xf32> to vector<1x8x8xf32>
    tpu.vector_store %arg11[%c0_39, %c0_40, %c56], %62 {strides = array<i32>} : memref<1x8x128xf32, #tpu.memory_space<vmem>>, vector<1x8x8xf32>,
    %63 = vector.extract_strided_slice %30 {offsets = [64, 0], sizes = [8, 8], strides = [1, 1]} : vector<128x8xf32> to vector<8x8xf32>
    %c0_41 = arith.constant 0 : index
    %c0_42 = arith.constant 0 : index
    %c64 = arith.constant 64 : index
    %64 = vector.load %arg11[%c0_41, %c0_42, %c64] : memref<1x8x128xf32, #tpu.memory_space<vmem>>, vector<1x8x8xf32>
    %65 = vector.shape_cast %64 : vector<1x8x8xf32> to vector<8x8xf32>
    %66 = vector.shape_cast %63 : vector<8x8xf32> to vector<1x8x8xf32>
    tpu.vector_store %arg11[%c0_41, %c0_42, %c64], %66 {strides = array<i32>} : memref<1x8x128xf32, #tpu.memory_space<vmem>>, vector<1x8x8xf32>,
    %67 = vector.extract_strided_slice %30 {offsets = [72, 0], sizes = [8, 8], strides = [1, 1]} : vector<128x8xf32> to vector<8x8xf32>
    %c0_43 = arith.constant 0 : index
    %c0_44 = arith.constant 0 : index
    %c72 = arith.constant 72 : index
    %68 = vector.load %arg11[%c0_43, %c0_44, %c72] : memref<1x8x128xf32, #tpu.memory_space<vmem>>, vector<1x8x8xf32>
    %69 = vector.shape_cast %68 : vector<1x8x8xf32> to vector<8x8xf32>
    %70 = vector.shape_cast %67 : vector<8x8xf32> to vector<1x8x8xf32>
    tpu.vector_store %arg11[%c0_43, %c0_44, %c72], %70 {strides = array<i32>} : memref<1x8x128xf32, #tpu.memory_space<vmem>>, vector<1x8x8xf32>,
    %71 = vector.extract_strided_slice %30 {offsets = [80, 0], sizes = [8, 8], strides = [1, 1]} : vector<128x8xf32> to vector<8x8xf32>
    %c0_45 = arith.constant 0 : index
    %c0_46 = arith.constant 0 : index
    %c80 = arith.constant 80 : index
    %72 = vector.load %arg11[%c0_45, %c0_46, %c80] : memref<1x8x128xf32, #tpu.memory_space<vmem>>, vector<1x8x8xf32>
    %73 = vector.shape_cast %72 : vector<1x8x8xf32> to vector<8x8xf32>
    %74 = vector.shape_cast %71 : vector<8x8xf32> to vector<1x8x8xf32>
    tpu.vector_store %arg11[%c0_45, %c0_46, %c80], %74 {strides = array<i32>} : memref<1x8x128xf32, #tpu.memory_space<vmem>>, vector<1x8x8xf32>,
    %75 = vector.extract_strided_slice %30 {offsets = [88, 0], sizes = [8, 8], strides = [1, 1]} : vector<128x8xf32> to vector<8x8xf32>
    %c0_47 = arith.constant 0 : index
    %c0_48 = arith.constant 0 : index
    %c88 = arith.constant 88 : index
    %76 = vector.load %arg11[%c0_47, %c0_48, %c88] : memref<1x8x128xf32, #tpu.memory_space<vmem>>, vector<1x8x8xf32>
    %77 = vector.shape_cast %76 : vector<1x8x8xf32> to vector<8x8xf32>
    %78 = vector.shape_cast %75 : vector<8x8xf32> to vector<1x8x8xf32>
    tpu.vector_store %arg11[%c0_47, %c0_48, %c88], %78 {strides = array<i32>} : memref<1x8x128xf32, #tpu.memory_space<vmem>>, vector<1x8x8xf32>,
    %79 = vector.extract_strided_slice %30 {offsets = [96, 0], sizes = [8, 8], strides = [1, 1]} : vector<128x8xf32> to vector<8x8xf32>
    %c0_49 = arith.constant 0 : index
    %c0_50 = arith.constant 0 : index
    %c96 = arith.constant 96 : index
    %80 = vector.load %arg11[%c0_49, %c0_50, %c96] : memref<1x8x128xf32, #tpu.memory_space<vmem>>, vector<1x8x8xf32>
    %81 = vector.shape_cast %80 : vector<1x8x8xf32> to vector<8x8xf32>
    %82 = vector.shape_cast %79 : vector<8x8xf32> to vector<1x8x8xf32>
    tpu.vector_store %arg11[%c0_49, %c0_50, %c96], %82 {strides = array<i32>} : memref<1x8x128xf32, #tpu.memory_space<vmem>>, vector<1x8x8xf32>,
    %83 = vector.extract_strided_slice %30 {offsets = [104, 0], sizes = [8, 8], strides = [1, 1]} : vector<128x8xf32> to vector<8x8xf32>
    %c0_51 = arith.constant 0 : index
    %c0_52 = arith.constant 0 : index
    %c104 = arith.constant 104 : index
    %84 = vector.load %arg11[%c0_51, %c0_52, %c104] : memref<1x8x128xf32, #tpu.memory_space<vmem>>, vector<1x8x8xf32>
    %85 = vector.shape_cast %84 : vector<1x8x8xf32> to vector<8x8xf32>
    %86 = vector.shape_cast %83 : vector<8x8xf32> to vector<1x8x8xf32>
    tpu.vector_store %arg11[%c0_51, %c0_52, %c104], %86 {strides = array<i32>} : memref<1x8x128xf32, #tpu.memory_space<vmem>>, vector<1x8x8xf32>,
    %87 = vector.extract_strided_slice %30 {offsets = [112, 0], sizes = [8, 8], strides = [1, 1]} : vector<128x8xf32> to vector<8x8xf32>
    %c0_53 = arith.constant 0 : index
    %c0_54 = arith.constant 0 : index
    %c112 = arith.constant 112 : index
    %88 = vector.load %arg11[%c0_53, %c0_54, %c112] : memref<1x8x128xf32, #tpu.memory_space<vmem>>, vector<1x8x8xf32>
    %89 = vector.shape_cast %88 : vector<1x8x8xf32> to vector<8x8xf32>
    %90 = vector.shape_cast %87 : vector<8x8xf32> to vector<1x8x8xf32>
    tpu.vector_store %arg11[%c0_53, %c0_54, %c112], %90 {strides = array<i32>} : memref<1x8x128xf32, #tpu.memory_space<vmem>>, vector<1x8x8xf32>,
    %91 = vector.extract_strided_slice %30 {offsets = [120, 0], sizes = [8, 8], strides = [1, 1]} : vector<128x8xf32> to vector<8x8xf32>
    %c0_55 = arith.constant 0 : index
    %c0_56 = arith.constant 0 : index
    %c120 = arith.constant 120 : index
    %92 = vector.load %arg11[%c0_55, %c0_56, %c120] : memref<1x8x128xf32, #tpu.memory_space<vmem>>, vector<1x8x8xf32>
    %93 = vector.shape_cast %92 : vector<1x8x8xf32> to vector<8x8xf32>
    %94 = vector.shape_cast %91 : vector<8x8xf32> to vector<1x8x8xf32>
    tpu.vector_store %arg11[%c0_55, %c0_56, %c120], %94 {strides = array<i32>} : memref<1x8x128xf32, #tpu.memory_space<vmem>>, vector<1x8x8xf32>,
    return
  }
  func.func @transform_0(%arg0: i32, %arg1: i32) -> (i32, i32) {
    %c0_i32 = arith.constant 0 : i32
    %c0_i32_0 = arith.constant 0 : i32
    return %arg1, %c0_i32 : i32, i32
  }
  func.func @transform_1(%arg0: i32, %arg1: i32) -> (i32, i32, i32) {
    %c0_i32 = arith.constant 0 : i32
    %c0_i32_0 = arith.constant 0 : i32
    %c0_i32_1 = arith.constant 0 : i32
    return %arg0, %c0_i32, %c0_i32_0 : i32, i32, i32
  }
  func.func @transform_2(%arg0: i32, %arg1: i32) -> (i32, i32, i32) {
    %c0_i32 = arith.constant 0 : i32
    %c0_i32_0 = arith.constant 0 : i32
    return %arg0, %arg1, %c0_i32 : i32, i32, i32
  }
  func.func @transform_3(%arg0: i32, %arg1: i32) -> (i32, i32, i32) {
    %c0_i32 = arith.constant 0 : i32
    %c0_i32_0 = arith.constant 0 : i32
    %c0_i32_1 = arith.constant 0 : i32
    %c0_i32_2 = arith.constant 0 : i32
    return %c0_i32, %c0_i32_0, %c0_i32_1 : i32, i32, i32
  }
  func.func @transform_4(%arg0: i32, %arg1: i32) -> (i32, i32) {
    %c0_i32 = arith.constant 0 : i32
    %c0_i32_0 = arith.constant 0 : i32
    %c0_i32_1 = arith.constant 0 : i32
    return %c0_i32, %c0_i32_0 : i32, i32
  }
  func.func @transform_5(%arg0: i32, %arg1: i32) -> (i32, i32) {
    %c0_i32 = arith.constant 0 : i32
    %c0_i32_0 = arith.constant 0 : i32
    %c0_i32_1 = arith.constant 0 : i32
    return %c0_i32, %c0_i32_0 : i32, i32
  }
  func.func @transform_6(%arg0: i32, %arg1: i32) -> (i32, i32) {
    %c0_i32 = arith.constant 0 : i32
    %c0_i32_0 = arith.constant 0 : i32
    %c0_i32_1 = arith.constant 0 : i32
    return %c0_i32, %c0_i32_0 : i32, i32
  }
  func.func @transform_7(%arg0: i32, %arg1: i32) -> (i32, i32) {
    %c0_i32 = arith.constant 0 : i32
    %c0_i32_0 = arith.constant 0 : i32
    %c0_i32_1 = arith.constant 0 : i32
    return %c0_i32, %c0_i32_0 : i32, i32
  }
  func.func @transform_8(%arg0: i32, %arg1: i32) -> (i32, i32) {
    %c0_i32 = arith.constant 0 : i32
    %c0_i32_0 = arith.constant 0 : i32
    %c0_i32_1 = arith.constant 0 : i32
    return %c0_i32, %c0_i32_0 : i32, i32
  }
  func.func @transform_9(%arg0: i32, %arg1: i32) -> (i32, i32, i32) {
    %c0_i32 = arith.constant 0 : i32
    %c0_i32_0 = arith.constant 0 : i32
    return %arg0, %arg1, %c0_i32 : i32, i32, i32
  }
}

</mosaic_0001>

<bundles_post_ra>
// kernel: tpu_custom_call.1
= control target key start
LH: loop header
LB: loop body
LE: loop exit
PB: predicated region body
PF: predicated region fallthrough
CT: control target
= control target key end

     0   :  { %14 = vsyncpa [#allocation3], 0  ;;  %s1947_s0 = inlined_call_operand.vmem [shape: bf16[256,144], index: 0, kind: input, shape index: {}]   ;;  %s1948_s1 = inlined_call_operand.vmem [shape: f32[2,16,8], index: 1, kind: input, shape index: {}]   ;;  %s1949_s2 = inlined_call_operand.vmem [shape: f32[2,256,6], index: 2, kind: input, shape index: {}]   ;;  %s1950_s3 = inlined_call_operand.vmem [shape: f32[9,1,8], index: 3, kind: input, shape index: {}]   ;;  %s1951_s4 = inlined_call_operand.vmem [shape: f32[1,8], index: 4, kind: input, shape index: {}]   ;;  %s1952_s5 = inlined_call_operand.vmem [shape: f32[8,8], index: 5, kind: input, shape index: {}]   ;;  %s1953_s6 = inlined_call_operand.vmem [shape: f32[1,8], index: 6, kind: input, shape index: {}]   ;;  %s1954_s7 = inlined_call_operand.vmem [shape: f32[6,8], index: 7, kind: input, shape index: {}]   ;;  %s1955_s8 = inlined_call_operand.vmem [shape: f32[1,8], index: 8, kind: input, shape index: {}]   ;;  %s1956_s9 = inlined_call_operand.hbm [shape: f32[2,16,128], index: 9, kind: output, shape index: {}]  }
   0x1   :  { %16 = vsyncpa [#allocation3 + $0x1], 0  ;;  %s1605_s30 = smov 0   ;;  %s1607_s10 = smov 0  }
   0x2   :  { %s1609_s11 = smov 0   ;;  %s1611_s12 = smov 0  }
   0x3   :  { %s1613_s13 = smov 0   ;;  %s1615_s14 = smov 0  }
   0x4   :  { %s1617_s15 = smov 0   ;;  %s1619_s16 = smov 0  }
   0x5 LB: > { %1963 = sst [smem:[#allocation5_spill]] %s1518_s11  ;;  %s1204_s17 = sadd.s32 4294967295, %s1538_s16   ;;  %s1538_s16 = sphi %s1619_s16, %s22_s16   ;;  %s1534_s15 = sphi %s1617_s15, %s1978_s15   ;;  %s1530_s14 = sphi %s1615_s14, %s1977_s14   ;;  %s1526_s13 = sphi %s1613_s13, %s1976_s13   ;;  %s1522_s12 = sphi %s1611_s12, %s1975_s12   ;;  %s1518_s11 = sphi %s1609_s11, %s1974_s11   ;;  %s1514_s10 = sphi %s1607_s10, %s1980_s10   ;;  %s1510_s30 = sphi %s1605_s30, %s1979_s30  }
   0x6   : > { %1964 = sst [smem:[#allocation6_spill]] %s1530_s14  ;;  %s1205_s18 = sadd.s32 4294967294, %s1538_s16  }
   0x7   : > { %1965 = sst [smem:[#allocation7_spill]] %s1534_s15  ;;  %s31_s19 = sadd.s32 1, %s1530_s14 }
   0x8   : > { %p32_p0 = scmp.ge.s32.totalorder %s31_s19, 2  ;;  %s34_s20 = sadd.s32 1, %s1534_s15 }
   0x9   : > { %p259_p1 = scmp.ne.s32.totalorder %s1518_s11, %s1514_s10  ;;  %p260_p2 = scmp.eq.s32.totalorder %s1204_s17, 3 }
   0xa   : > { %s1982_s19 = smov (%p32_p0, %s31_s19), 0  ;;  %s1984_s20 = smov (!%p32_p0, %s34_s20), %s1534_s15 }
   0xb   : > { %1966 = sst [smem:[#allocation8_spill]] %s1982_s19  ;;  %s245_s21 = ssub.s32 %s1530_s14, %s1982_s19 }
   0xc   : > { %p1656_p3 = por %p260_p2, %p259_p1  ;;  %p36_p4 = scmp.ge.s32.totalorder %s1984_s20, 2 }
   0xd   : > { %p265_p5 = scmp.ne.s32.totalorder %s1514_s10, %s1510_s30  ;;  %p266_p6 = scmp.eq.s32.totalorder %s1205_s18, 3 }
   0xe   : > { %p1208_p7 = scmp.ge.s32.totalorder %s1538_s16, 1  ;;  %s1986_s20 = smov (%p36_p4, %s1984_s20), 0 }
   0xf   : > { %1968 = sst [smem:[#allocation9_spill]] %s1986_s20  ;;  %p1665_p8 = por %p266_p6, %p265_p5 }
  0x10   : > { %p333_p9 = scmp.lt.s32.totalorder %s1538_s16, 5  ;;  %s244_s24 = ssub.s32 %s1534_s15, %s1986_s20 }
  0x11   : > { %s1969_s23 = scalar_select %p1665_p8, 1, 0 }
  0x12   : > { %s249_s25 = sadd.s32 1, %s1518_s11  ;;  %s246_s26 = sor.u32 %s245_s21, %s244_s24 }
  0x13   : > { %1970 = sst [smem:[#allocation10_spill]] %s1969_s23  ;;  %p334_p10 = pnand %p1208_p7, %p333_p9 }
  0x14   : > { %p247_p11 = scmp.eq.s32.totalorder %s246_s26, 0  ;;  %s1210_s28 = sshll.u32 (!%p334_p10), %s1522_s12, 4 }
  0x15   : > { %337 = sbr.rel (%p334_p10) target bundleno = 567 (0x237), region = 56  ;;  %p391_p12 = scmp.lt.s32.totalorder (!%p334_p10), %s1526_s13, 1 }
  0x16   : > { %s1674_s27 = scalar_select %p247_p11, %s1518_s11, %s249_s25  }
  0x17   : > { %p385_p13 = scmp.lt.s32.totalorder (!%p334_p10), %s1210_s28, 31  ;;  %s381_s19 = sand.u32 (!%p334_p10), 1, %s1514_s10  }
  0x18   : > { %1971 = sst [smem:[#allocation11_spill]] %s1674_s27  ;;  %s1540_s17 = smov (!%p334_p10), 8  }
  0x19   : > { %s1542_s27 = smov (!%p334_p10), 24   ;;  %s1545_s18 = smov (!%p334_p10), 48  }
  0x1a   : > { %s392_s29 = scalar_select %p391_p12, %s1526_s13, 1  ;;  %v1432_v0 = vld [vmem:[%s1950_s3 + $0x7] ss:$0 sm:$0xff]  ;;  %v1433_v1 = vld [vmem:[%s1950_s3 + $0x6] ss:$0 sm:$0xff]  ;;  %vm564_vm0 = vcmask 130048  }
  0x1b   : > { %s1988_s28 = smov (!%p385_p13, %s1210_s28), 31  ;;  %v1434_v2 = vld [vmem:[%s1950_s3 + $0x5] ss:$0 sm:$0xff]  ;;  %v1438_v9 = vld [vmem:[%s1950_s3 + $0x8] ss:$0 sm:$0xff]  ;;  %vm892_vm1 = vcmask 1045504  }
  0x1c   : > { %s1329_s21 = sshll.u32 %s392_s29, 4  ;;  %s1216_s24 = sshll.u32 %s392_s29, 5  ;;  %v1435_v12 = vld [vmem:[%s1950_s3 + $0x4] ss:$0 sm:$0xff]  ;;  %v1436_v24 = vld [vmem:[%s1950_s3 + $0x3] ss:$0 sm:$0xff] }
  0x1d   : > { %s1328_s25 = sshll.u32 %s1988_s28, 3  ;;  %s395_s14 = scalar_lea.vmem %s1948_s1, %s1329_s21  ;;  %v1437_v28 = vld [vmem:[%s1950_s3 + $0x2] ss:$0 sm:$0xff]  ;;  %v1439_v32 = vld [vmem:[%s1950_s3 + $0x1] ss:$0 sm:$0xff]  ;;  %vm843_vm2 = vcmask 48128  }
  0x1e   : > { %s1691_s23 = sadd.s32 %s1216_s24, %s1988_s28  ;;  %v407_v3 = vld [vmem:[%s395_s14] sm:$0xff]  ;;  %v408_v4 = vld [vmem:[%s395_s14 + $0x8] sm:$0xff]  ;;  %s1699_s15 = scalar_lea.vmem %s1947_s0, %s1328_s25  ;;  %vm708_vm3 = vcmask 64512   ;;  %vm998_vm4 = vcmask 130112   ;;  %vm1004_vm5 = vcmask 195712   ;;  %vm1010_vm6 = vcmask 261312  }
  0x1f   : > { %v459_v5 = vmul.f32 %v1432_v0, %v407_v3  ;;  %v460_v6 = vmul.f32 %v1432_v0, %v408_v4  ;;  %v457_v7 = vmul.f32 %v1433_v1, %v407_v3  ;;  %v458_v8 = vmul.f32 %v1433_v1, %v408_v4  ;;  %v1330_v17 = vld [vmem:[%s1699_s15 + $0x4] sm:$0xf]  ;;  %v1222_v18 = vld [vmem:[%s1699_s15 + $0x8] sm:$0xf0]  ;;  %v1440_v36 = vld [vmem:[%s1950_s3] ss:$0 sm:$0xff] }
  0x20   : > { %v455_v11 = vmul.f32 %v1434_v2, %v407_v3  ;;  %v456_v14 = vmul.f32 %v1434_v2, %v408_v4  ;;  %v461_v15 = vmul.f32 %v1438_v9, %v407_v3  ;;  %v462_v16 = vmul.f32 %v1438_v9, %v408_v4  ;;  %v1332_v37 = vld [vmem:[%s1699_s15 + $0x14] sm:$0xf]  ;;  %v1230_v38 = vld [vmem:[%s1699_s15 + $0x18] sm:$0xf0]  ;;  %v1220_v44 = vld [vmem:[%s1699_s15] sm:$0xf] }
  0x21   : > { %v470_v10 = vpack.c.bf16 %v460_v6, %v459_v5  ;;  %v469_v13 = vpack.c.bf16 %v458_v8, %v457_v7  ;;  %v1225_v20 = vor.u32 %v1330_v17, %v1222_v18  ;;  %v453_v22 = vmul.f32 %v1435_v12, %v407_v3  ;;  %v1331_v45 = vld [vmem:[%s1699_s15 + $0x4] sm:$0xf0]  ;;  %v1334_v47 = vld [vmem:[%s1699_s15 + $0x24] sm:$0xf]  ;;  %v1238_v48 = vld [vmem:[%s1699_s15 + $0x28] sm:$0xf0] }
  0x22   : > { %v471_v19 = vpack.c.bf16 %v462_v16, %v461_v15  ;;  %v468_v21 = vpack.c.bf16 %v456_v14, %v455_v11  ;;  %v454_v23 = vmul.f32 %v1435_v12, %v408_v4  ;;  %v451_v26 = vmul.f32 %v1436_v24, %v407_v3  ;;  %v1228_v50 = vld [vmem:[%s1699_s15 + $0x10] sm:$0xf]  ;;  %v1333_v51 = vld [vmem:[%s1699_s15 + $0x14] sm:$0xf0]  ;;  %v1336_v53 = vld [vmem:[%s1699_s15 + $0x34] sm:$0xf] }
  0x23   : > { %589 = vmatpush.bf16.msra.mxu0 %v470_v10  ;;  %v452_v27 = vmul.f32 %v1436_v24, %v408_v4  ;;  %v449_v30 = vmul.f32 %v1437_v28, %v407_v3  ;;  %v450_v31 = vmul.f32 %v1437_v28, %v408_v4  ;;  %v447_v34 = vmul.f32 %v1439_v32, %v407_v3  ;;  %v1246_v54 = vld [vmem:[%s1699_s15 + $0x38] sm:$0xf0]  ;;  %v1236_v56 = vld [vmem:[%s1699_s15 + $0x20] sm:$0xf]  ;;  %v1335_v57 = vld [vmem:[%s1699_s15 + $0x24] sm:$0xf0] }
  0x24   : > { %645 = vmatpush.bf16.msra.mxu1 %v471_v19  ;;  %v467_v25 = vpack.c.bf16 %v454_v23, %v453_v22  ;;  %v448_v35 = vmul.f32 %v1439_v32, %v408_v4  ;;  %v1233_v39 = vor.u32 %v1332_v37, %v1230_v38  ;;  %v445_v41 = vmul.f32 %v1440_v36, %v407_v3  ;;  %v1338_v59 = vld [vmem:[%s1699_s15 + $0x44] sm:$0xf]  ;;  %v1254_v60 = vld [vmem:[%s1699_s15 + $0x48] sm:$0xf0]  ;;  %v1244_v62 = vld [vmem:[%s1699_s15 + $0x30] sm:$0xf] }
  0x25   : > { %v466_v29 = vpack.c.bf16 %v452_v27, %v451_v26  ;;  %v465_v33 = vpack.c.bf16 %v450_v31, %v449_v30  ;;  %v446_v42 = vmul.f32 %v1440_v36, %v408_v4  ;;  %v1221_v46 = vor.u32 %v1331_v45, %v1220_v44  ;;  %v1337_v63 = vld [vmem:[%s1699_s15 + $0x34] sm:$0xf0]  ;;  %v1340_v1 = vld [vmem:[%s1699_s15 + $0x54] sm:$0xf]  ;;  %v1262_v2 = vld [vmem:[%s1699_s15 + $0x58] sm:$0xf0] }
  0x26   : > { %v464_v40 = vpack.c.bf16 %v448_v35, %v447_v34  ;;  %v1241_v49 = vor.u32 %v1334_v47, %v1238_v48  ;;  %v1229_v52 = vor.u32 %v1333_v51, %v1228_v50  ;;  %v1249_v55 = vor.u32 %v1336_v53, %v1246_v54  ;;  %v1252_v4 = vld [vmem:[%s1699_s15 + $0x40] sm:$0xf]  ;;  %v1339_v5 = vld [vmem:[%s1699_s15 + $0x44] sm:$0xf0]  ;;  %v1342_v7 = vld [vmem:[%s1699_s15 + $0x64] sm:$0xf] }
  0x27   : > { %590 = vmatpush.bf16.msra.mxu0 %v469_v13  ;;  %1282 = vmatmul.msk.bf16.vlgmr.msra.gmra.mxu1 %vm564_vm0, %v1225_v20  ;;  %v463_v43 = vpack.c.bf16 %v446_v42, %v445_v41  ;;  %v1237_v58 = vor.u32 %v1335_v57, %v1236_v56  ;;  %v1257_v61 = vor.u32 %v1338_v59, %v1254_v60  ;;  %v1270_v8 = vld [vmem:[%s1699_s15 + $0x68] sm:$0xf0]  ;;  %v1260_v10 = vld [vmem:[%s1699_s15 + $0x50] sm:$0xf]  ;;  %v1341_v11 = vld [vmem:[%s1699_s15 + $0x54] sm:$0xf0] }
  0x28   : > { %v1245_v0 = vor.u32 %v1337_v63, %v1244_v62  ;;  %v1265_v3 = vor.u32 %v1340_v1, %v1262_v2  ;;  %v1253_v6 = vor.u32 %v1339_v5, %v1252_v4  ;;  %v1273_v9 = vor.u32 %v1342_v7, %v1270_v8  ;;  %v1344_v13 = vld [vmem:[%s1699_s15 + $0x74] sm:$0xf]  ;;  %v1278_v14 = vld [vmem:[%s1699_s15 + $0x78] sm:$0xf0]  ;;  %v1268_v16 = vld [vmem:[%s1699_s15 + $0x60] sm:$0xf] }
  0x29   : > { %v1261_v12 = vor.u32 %v1341_v11, %v1260_v10  ;;  %v1281_v15 = vor.u32 %v1344_v13, %v1278_v14  ;;  %v1343_v17 = vld [vmem:[%s1699_s15 + $0x64] sm:$0xf0]  ;;  %s1217_s20 = sshll.u32 %s1691_s23, 3  ;;  %v703_v19 = vld [vmem:[%s1952_s5] sm:$0xff]  ;;  %v1276_v23 = vld [vmem:[%s1699_s15 + $0x70] sm:$0xf] }
  0x2a   : > { %v1269_v18 = vor.u32 %v1343_v17, %v1268_v16  ;;  %s1758_s11 = scalar_lea.vmem %s1949_s2, %s1217_s20  ;;  %v838_v20 = vld [vmem:[%s1954_s7] sm:$0x3f]  ;;  %772 = vmatpush.msra.mxu2 %v703_v19  ;;  %v1345_v24 = vld [vmem:[%s1699_s15 + $0x74] sm:$0xf0]  ;;  %s1209_s20 = sshll.u32 %s381_s19, 3  ;;  %vm1016_vm7 = vcmask 326912  }
  0x2b   : > { %591 = vmatpush.bf16.msra.mxu0 %v468_v21  ;;  %1306 = vmatpush.msk.msra.mxu3 %vm892_vm1, %v838_v20  ;;  %v822_v21 = vld [vmem:[%s1758_s11] sm:$0xff]  ;;  %v1277_v26 = vor.u32 %v1345_v24, %v1276_v23  ;;  %v824_v28 = vld [vmem:[%s1758_s11 + $0x10] sm:$0xff]  ;;  %v825_v31 = vld [vmem:[%s1758_s11 + $0x18] sm:$0xff]  ;;  %s1853_s29 = scalar_lea.vmem [#allocation2], %s1209_s20  ;;  %s1543_s14 = smov 32   ;;  %vm1022_vm8 = vcmask 392512  }
  0x2c   : > { %1307 = vmatmul.msk.f32.vlgmr.msra.gmra.mxu3 %vm843_vm2, %v822_v21  ;;  %v1777_v30 = vld [vmem:[%s1951_s4] ss:$0 sm:$0xff]  ;;  %v829_v54 = vld [vmem:[%s1758_s11 + $0x38] sm:$0xff]  ;;  %v831_v2 = vld [vmem:[%s1758_s11 + $0x48] sm:$0xff]  ;;  %s1544_s28 = smov 40   ;;  %s1546_s23 = smov 56  }
  0x2d   : > { %v826_v37 = vld [vmem:[%s1758_s11 + $0x20] sm:$0xff]  ;;  %v832_v8 = vld [vmem:[%s1758_s11 + $0x50] sm:$0xff]  ;;  %v833_v14 = vld [vmem:[%s1758_s11 + $0x58] sm:$0xff]  ;;  %s1547_s21 = smov 64   ;;  %s1548_s15 = smov 72   ;;  %vm1028_vm9 = vcmask 458112  }
  0x2e   : > { %v830_v60 = vld [vmem:[%s1758_s11 + $0x40] sm:$0xff]  ;;  %s1549_s24 = smov 80   ;;  %s1550_s25 = smov 88   ;;  %vm1034_vm10 = vcmask 523712   ;;  %vm1040_vm11 = vcmask 589312   ;;  %vm1046_vm12 = vcmask 654912  }
  0x2f   : > { %592 = vmatpush.bf16.msra.mxu0 %v467_v25  ;;  %v823_v25 = vld [vmem:[%s1758_s11 + $0x8] sm:$0xff]  ;;  %v834_v19 = vld [vmem:[%s1758_s11 + $0x60] sm:$0xff]  ;;  %s1551_s26 = smov 96   ;;  %s1552_s20 = smov 104   ;;  %vm1052_vm13 = vcmask 720512   ;;  %vm1058_vm14 = vcmask 786112  }
  0x30   : > { %vm1064_vm15 = vcmask 851712   ;;  %vm1076_vm1 = vcmask 982912  }
  0x33   : > { %593 = vmatpush.bf16.msra.mxu0 %v466_v29 }
  0x34   : > { %1308 = vmatmul.msk.f32.gmra.mxu3 %vm843_vm2, %v823_v25  ;;  %v835_v25 = vld [vmem:[%s1758_s11 + $0x68] sm:$0xff] }
  0x37   : > { %594 = vmatpush.bf16.msra.mxu0 %v465_v33  ;;  %1283 = vmatmul.msk.bf16.gmra.mxu1 %vm564_vm0, %v1233_v39 }
  0x3b   : > { %595 = vmatpush.bf16.msra.mxu0 %v464_v40 }
  0x3c   : > { %1309 = vmatmul.msk.f32.gmra.mxu3 %vm843_vm2, %v824_v28 }
  0x3f   : > { %596 = vmatpush.bf16.msra.mxu0 %v463_v43  ;;  %v827_v43 = vld [vmem:[%s1758_s11 + $0x28] sm:$0xff] }
  0x42   : > { %597 = vmatmul.bf16.vlgmr.msra.gmra.mxu0 %v1221_v46 }
  0x44   : > { %1310 = vmatmul.msk.f32.gmra.mxu3 %vm843_vm2, %v825_v31 }
  0x47   : > { %1284 = vmatmul.msk.bf16.gmra.mxu1 %vm564_vm0, %v1241_v49  ;;  %v828_v49 = vld [vmem:[%s1758_s11 + $0x30] sm:$0xff] }
  0x4c   : > { %1311 = vmatmul.msk.f32.gmra.mxu3 %vm843_vm2, %v826_v37 }
  0x52   : > { %602 = vmatmul.bf16.gmra.mxu0 %v1229_v52 }
  0x54   : > { %1312 = vmatmul.msk.f32.gmra.mxu3 %vm843_vm2, %v827_v43 }
  0x57   : > { %1285 = vmatmul.msk.bf16.gmra.mxu1 %vm564_vm0, %v1249_v55 }
  0x5c   : > { %1313 = vmatmul.msk.f32.gmra.mxu3 %vm843_vm2, %v828_v49 }
  0x62   : > { %607 = vmatmul.bf16.gmra.mxu0 %v1237_v58 }
  0x64   : > { %1314 = vmatmul.msk.f32.gmra.mxu3 %vm843_vm2, %v829_v54 }
  0x67   : > { %1286 = vmatmul.msk.bf16.gmra.mxu1 %vm564_vm0, %v1257_v61 }
  0x6c   : > { %1315 = vmatmul.msk.f32.gmra.mxu3 %vm843_vm2, %v830_v60 }
  0x72   : > { %612 = vmatmul.bf16.gmra.mxu0 %v1245_v0 }
  0x74   : > { %1316 = vmatmul.msk.f32.gmra.mxu3 %vm843_vm2, %v831_v2 }
  0x77   : > { %1287 = vmatmul.msk.bf16.gmra.mxu1 %vm564_vm0, %v1265_v3 }
  0x7c   : > { %1317 = vmatmul.msk.f32.gmra.mxu3 %vm843_vm2, %v832_v8 }
  0x82   : > { %617 = vmatmul.bf16.gmra.mxu0 %v1253_v6 }
  0x84   : > { %1318 = vmatmul.msk.f32.gmra.mxu3 %vm843_vm2, %v833_v14 }
  0x87   : > { %1288 = vmatmul.msk.bf16.gmra.mxu1 %vm564_vm0, %v1273_v9 }
  0x8c   : > { %1319 = vmatmul.msk.f32.gmra.mxu3 %vm843_vm2, %v834_v19 }
  0x92   : > { %622 = vmatmul.bf16.gmra.mxu0 %v1261_v12 }
  0x94   : > { %1320 = vmatmul.msk.f32.gmra.mxu3 %vm843_vm2, %v835_v25 }
  0x97   : > { %1289 = vmatmul.msk.bf16.gmra.mxu1 %vm564_vm0, %v1281_v15  ;;  %vm1070_vm0 = vcmask 917312  }
  0xa2   : > { %627 = vmatmul.bf16.gmra.mxu0 %v1269_v18 }
  0xa4   : > { %v647_v22 = vpop.f32.mrf.mxu1 }
  0xac   : > { %v649_v27 = vpop.f32.mrf.mxu1 }
  0xb2   : > { %632 = vmatmul.bf16.gmra.mxu0 %v1277_v26 }
  0xb4   : > { %v652_v29 = vpop.f32.mrf.mxu1 }
  0xbc   : > { %v654_v34 = vpop.f32.mrf.mxu1 }
  0xbf   : > { %v598_v32 = vpop.f32.mrf.mxu0 }
  0xc0   : > { %v599_v33 = vadd.f32 %v1777_v30, %v598_v32  ;;  %v836_v32 = vld [vmem:[%s1758_s11 + $0x70] sm:$0xff] }
  0xc1   : > { %1321 = vmatmul.msk.f32.gmra.mxu3 %vm843_vm2, %v836_v32 }
  0xc2   : > { %v648_v35 = vadd.f32 %v647_v22, %v599_v33 }
  0xc4   : > { %v687_v36 = vmax.f32 %v648_v35, 0.0  ;;  %v657_v41 = vpop.f32.mrf.mxu1 }
  0xc6   : > { %1290 = vmatmul.msk.f32.vlgmr.msra.gmra.mxu2 %vm708_vm3, %v687_v36 }
  0xc7   : > { %v600_v38 = vpop.f32.mrf.mxu0 }
  0xc8   : > { %v601_v39 = vadd.f32 %v1777_v30, %v600_v38  ;;  %v837_v38 = vld [vmem:[%s1758_s11 + $0x78] sm:$0xff]  ;;  %s1541_s11 = smov 16  }
  0xc9   : > { %1322 = vmatmul.msk.f32.gmra.mxu3 %vm843_vm2, %v837_v38  ;;  %vm1082_vm2 = vcmask 1048512  }
  0xca   : > { %v650_v40 = vadd.f32 %v649_v27, %v601_v39 }
  0xcc   : > { %v688_v42 = vmax.f32 %v650_v40, 0.0  ;;  %v659_v48 = vpop.f32.mrf.mxu1 }
  0xce   : > { %1291 = vmatmul.msk.f32.gmra.mxu2 %vm708_vm3, %v688_v42 }
  0xcf   : > { %v603_v44 = vpop.f32.mrf.mxu0 }
  0xd0   : > { %v604_v45 = vadd.f32 %v1777_v30, %v603_v44 }
  0xd2   : > { %v653_v46 = vadd.f32 %v652_v29, %v604_v45 }
  0xd4   : > { %v689_v47 = vmax.f32 %v653_v46, 0.0  ;;  %v662_v56 = vpop.f32.mrf.mxu1  ;;  %v913_v46 = vpop.f32.mrf.mxu3 }
  0xd6   : > { %1292 = vmatmul.msk.f32.gmra.mxu2 %vm708_vm3, %v689_v47 }
  0xd7   : > { %v605_v50 = vpop.f32.mrf.mxu0 }
  0xd8   : > { %v606_v51 = vadd.f32 %v1777_v30, %v605_v50 }
  0xda   : > { %v655_v52 = vadd.f32 %v654_v34, %v606_v51 }
  0xdc   : > { %v690_v53 = vmax.f32 %v655_v52, 0.0  ;;  %v664_v63 = vpop.f32.mrf.mxu1  ;;  %v916_v52 = vpop.f32.mrf.mxu3 }
  0xde   : > { %1293 = vmatmul.msk.f32.gmra.mxu2 %vm708_vm3, %v690_v53 }
  0xdf   : > { %v608_v55 = vpop.f32.mrf.mxu0 }
  0xe0   : > { %v609_v57 = vadd.f32 %v1777_v30, %v608_v55 }
  0xe2   : > { %v658_v58 = vadd.f32 %v657_v41, %v609_v57 }
  0xe4   : > { %v691_v59 = vmax.f32 %v658_v58, 0.0  ;;  %v667_v6 = vpop.f32.mrf.mxu1 }
  0xe6   : > { %1294 = vmatmul.msk.f32.gmra.mxu2 %vm708_vm3, %v691_v59  ;;  %v919_v59 = vpop.f32.mrf.mxu3 }
  0xe7   : > { %v610_v61 = vpop.f32.mrf.mxu0 }
  0xe8   : > { %v611_v62 = vadd.f32 %v1777_v30, %v610_v61  ;;  %v1840_v61 = vld [vmem:[%s1955_s8] ss:$0 sm:$0xff] }
  0xea   : > { %v660_v0 = vadd.f32 %v659_v48, %v611_v62 }
  0xec   : > { %v692_v1 = vmax.f32 %v660_v0, 0.0  ;;  %v669_v13 = vpop.f32.mrf.mxu1 }
  0xee   : > { %1295 = vmatmul.msk.f32.gmra.mxu2 %vm708_vm3, %v692_v1  ;;  %v922_v62 = vpop.f32.mrf.mxu3 }
  0xef   : > { %v613_v3 = vpop.f32.mrf.mxu0 }
  0xf0   : > { %v614_v4 = vadd.f32 %v1777_v30, %v613_v3 }
  0xf2   : > { %v663_v5 = vadd.f32 %v662_v56, %v614_v4 }
  0xf4   : > { %v693_v7 = vmax.f32 %v663_v5, 0.0  ;;  %v672_v21 = vpop.f32.mrf.mxu1  ;;  %v917_v5 = vadd.f32 %v1840_v61, %v916_v52 }
  0xf6   : > { %1296 = vmatmul.msk.f32.gmra.mxu2 %vm708_vm3, %v693_v7  ;;  %v925_v4 = vpop.f32.mrf.mxu3 }
  0xf7   : > { %v615_v9 = vpop.f32.mrf.mxu0 }
  0xf8   : > { %v616_v10 = vadd.f32 %v1777_v30, %v615_v9 }
  0xfa   : > { %v665_v11 = vadd.f32 %v664_v63, %v616_v10  ;;  %v1845_v63 = vld [vmem:[%s1953_s6] ss:$0 sm:$0xff]  ;;  %v920_v10 = vadd.f32 %v1840_v61, %v919_v59 }
  0xfc   : > { %v694_v12 = vmax.f32 %v665_v11, 0.0  ;;  %v674_v28 = vpop.f32.mrf.mxu1 }
  0xfe   : > { %1297 = vmatmul.msk.f32.gmra.mxu2 %vm708_vm3, %v694_v12  ;;  %v928_v12 = vpop.f32.mrf.mxu3 }
  0xff   : > { %v618_v15 = vpop.f32.mrf.mxu0 }
 0x100   : > { %v619_v16 = vadd.f32 %v1777_v30, %v618_v15 }
 0x102   : > { %v668_v17 = vadd.f32 %v667_v6, %v619_v16  ;;  %v923_v16 = vadd.f32 %v1840_v61, %v922_v62 }
 0x104   : > { %v695_v18 = vmax.f32 %v668_v17, 0.0  ;;  %v677_v36 = vpop.f32.mrf.mxu1 }
 0x106   : > { %1298 = vmatmul.msk.f32.gmra.mxu2 %vm708_vm3, %v695_v18  ;;  %v931_v19 = vpop.f32.mrf.mxu3 }
 0x107   : > { %v620_v20 = vpop.f32.mrf.mxu0 }
 0x108   : > { %v621_v22 = vadd.f32 %v1777_v30, %v620_v20 }
 0x10a   : > { %v670_v23 = vadd.f32 %v669_v13, %v621_v22  ;;  %v926_v22 = vadd.f32 %v1840_v61, %v925_v4 }
 0x10c   : > { %v696_v24 = vmax.f32 %v670_v23, 0.0  ;;  %v679_v43 = vpop.f32.mrf.mxu1 }
 0x10e   : > { %1299 = vmatmul.msk.f32.gmra.mxu2 %vm708_vm3, %v696_v24 }
 0x10f   : > { %v623_v26 = vpop.f32.mrf.mxu0 }
 0x110   : > { %v624_v27 = vadd.f32 %v1777_v30, %v623_v26  ;;  %v934_v26 = vpop.f32.mrf.mxu3 }
 0x112   : > { %v673_v29 = vadd.f32 %v672_v21, %v624_v27 }
 0x114   : > { %v697_v31 = vmax.f32 %v673_v29, 0.0  ;;  %v682_v49 = vpop.f32.mrf.mxu1 }
 0x116   : > { %1300 = vmatmul.msk.f32.gmra.mxu2 %vm708_vm3, %v697_v31 }
 0x117   : > { %v625_v33 = vpop.f32.mrf.mxu0 }
 0x118   : > { %v626_v34 = vadd.f32 %v1777_v30, %v625_v33 }
 0x11a   : > { %v675_v35 = vadd.f32 %v674_v28, %v626_v34  ;;  %v929_v28 = vadd.f32 %v1840_v61, %v928_v12  ;;  %v937_v34 = vpop.f32.mrf.mxu3 }
 0x11c   : > { %v698_v37 = vmax.f32 %v675_v35, 0.0  ;;  %v684_v57 = vpop.f32.mrf.mxu1  ;;  %v932_v35 = vadd.f32 %v1840_v61, %v931_v19 }
 0x11e   : > { %1301 = vmatmul.msk.f32.gmra.mxu2 %vm708_vm3, %v698_v37 }
 0x11f   : > { %v628_v39 = vpop.f32.mrf.mxu0 }
 0x120   : > { %v629_v40 = vadd.f32 %v1777_v30, %v628_v39 }
 0x122   : > { %v678_v41 = vadd.f32 %v677_v36, %v629_v40  ;;  %v935_v40 = vadd.f32 %v1840_v61, %v934_v26 }
 0x124   : > { %v699_v42 = vmax.f32 %v678_v41, 0.0 }
 0x126   : > { %1302 = vmatmul.msk.f32.gmra.mxu2 %vm708_vm3, %v699_v42  ;;  %v940_v42 = vpop.f32.mrf.mxu3 }
 0x127   : > { %v630_v44 = vpop.f32.mrf.mxu0  ;;  %v941_v52 = vadd.f32 %v1840_v61, %v940_v42 }
 0x128   : > { %v631_v45 = vadd.f32 %v1777_v30, %v630_v44 }
 0x12a   : > { %v680_v47 = vadd.f32 %v679_v43, %v631_v45 }
 0x12c   : > { %v700_v48 = vmax.f32 %v680_v47, 0.0 }
 0x12e   : > { %1303 = vmatmul.msk.f32.gmra.mxu2 %vm708_vm3, %v700_v48 }
 0x12f   : > { %v633_v50 = vpop.f32.mrf.mxu0 }
 0x130   : > { %v634_v51 = vadd.f32 %v1777_v30, %v633_v50 }
 0x132   : > { %v683_v53 = vadd.f32 %v682_v49, %v634_v51  ;;  %v943_v49 = vpop.f32.mrf.mxu3 }
 0x134   : > { %v701_v54 = vmax.f32 %v683_v53, 0.0 }
 0x136   : > { %1304 = vmatmul.msk.f32.gmra.mxu2 %vm708_vm3, %v701_v54 }
 0x137   : > { %v635_v55 = vpop.f32.mrf.mxu0 }
 0x138   : > { %v636_v56 = vadd.f32 %v1777_v30, %v635_v55  ;;  %v914_v30 = vadd.f32 %v1840_v61, %v913_v46  ;;  %v938_v46 = vadd.f32 %v1840_v61, %v937_v34 }
 0x13a   : > { %v685_v58 = vadd.f32 %v684_v57, %v636_v56  ;;  %v946_v56 = vpop.f32.mrf.mxu3 }
 0x13c   : > { %v702_v60 = vmax.f32 %v685_v58, 0.0  ;;  %v944_v58 = vadd.f32 %v1840_v61, %v943_v49 }
 0x13e   : > { %1305 = vmatmul.msk.f32.gmra.mxu2 %vm708_vm3, %v702_v60 }
 0x149   : > { %v774_v0 = vpop.f32.mrf.mxu2 }
 0x14a   : > { %v775_v1 = vadd.f32 %v1845_v63, %v774_v0  ;;  %v949_v0 = vpop.f32.mrf.mxu3 }
 0x14c   : > { %v961_v2 = vadd.f32 %v914_v30, %v775_v1  ;;  %v947_v1 = vadd.f32 %v1840_v61, %v946_v56 }
 0x14e   : > { %v977_v3 = vmax.f32 %v961_v2, 0.0 }
 0x150   : > { %993 = vst.msk [vmem:[%s1853_s29] sm:$0xff] %vm708_vm3, %v977_v3 }
 0x151   : > { %v777_v6 = vpop.f32.mrf.mxu2 }
 0x152   : > { %v778_v7 = vadd.f32 %v1845_v63, %v777_v6  ;;  %v950_v6 = vadd.f32 %v1840_v61, %v949_v0 }
 0x154   : > { %v962_v8 = vadd.f32 %v917_v5, %v778_v7 }
 0x156   : > { %v978_v9 = vmax.f32 %v962_v8, 0.0  ;;  %v952_v8 = vpop.f32.mrf.mxu3 }
 0x157   : > { %v953_v12 = vadd.f32 %v1840_v61, %v952_v8 }
 0x158   : > { %995 = vrot.lane.b32.xlu0 %v978_v9, %s1540_s17  ;;  %s1553_s17 = smov 112  }
 0x159   : > { %v780_v11 = vpop.f32.mrf.mxu2 }
 0x15a   : > { %v781_v13 = vadd.f32 %v1845_v63, %v780_v11 }
 0x15c   : > { %v963_v14 = vadd.f32 %v920_v10, %v781_v13 }
 0x15e   : > { %v979_v15 = vmax.f32 %v963_v14, 0.0 }
 0x160   : > { %1001 = vrot.lane.b32.xlu0 %v979_v15, %s1541_s11  ;;  %v955_v15 = vpop.f32.mrf.mxu3  ;;  %s1554_s11 = smov 120  }
 0x161   : > { %v783_v17 = vpop.f32.mrf.mxu2 }
 0x162   : > { %v784_v18 = vadd.f32 %v1845_v63, %v783_v17 }
 0x164   : > { %v964_v20 = vadd.f32 %v923_v16, %v784_v18  ;;  %v956_v18 = vadd.f32 %v1840_v61, %v955_v15 }
 0x166   : > { %v980_v21 = vmax.f32 %v964_v20, 0.0 }
 0x168   : > { %1007 = vrot.lane.b32.xlu1 %v980_v21, %s1542_s27  ;;  %s1324_s27 = sshll.u32 %s1526_s13, 1 }
 0x169   : > { %v786_v23 = vpop.f32.mrf.mxu2 }
 0x16a   : > { %v787_v24 = vadd.f32 %v1845_v63, %v786_v23 }
 0x16c   : > { %v965_v25 = vadd.f32 %v926_v22, %v787_v24  ;;  %v958_v22 = vpop.f32.mrf.mxu3 }
 0x16d   : > { %v959_v24 = vadd.f32 %v1840_v61, %v958_v22 }
 0x16e   : > { %v981_v27 = vmax.f32 %v965_v25, 0.0 }
 0x170   : > { %1013 = vrot.lane.b32.xlu1 %v981_v27, %s1543_s14  ;;  %s1095_s14 = sadd.s32 %s1522_s12, %s1324_s27  ;;  %s1085_s12 = scalar_lea.sflag [#allocation3], %s381_s19 }
 0x171   : > { %v789_v29 = vpop.f32.mrf.mxu2 }
 0x172   : > { %v790_v31 = vadd.f32 %v1845_v63, %v789_v29 }
 0x174   : > { %v966_v32 = vadd.f32 %v929_v28, %v790_v31 }
 0x176   : > { %v982_v33 = vmax.f32 %v966_v32, 0.0 }
 0x178   : > { %1019 = vrot.lane.b32.xlu2 %v982_v33, %s1544_s28  ;;  %s1325_s28 = sshll.u32 %s1095_s14, 3 }
 0x179   : > { %v792_v36 = vpop.f32.mrf.mxu2 }
 0x17a   : > { %v793_v37 = vadd.f32 %v1845_v63, %v792_v36 }
 0x17c   : > { %v967_v38 = vadd.f32 %v932_v35, %v793_v37 }
 0x17e   : > { %v983_v39 = vmax.f32 %v967_v38, 0.0 }
 0x180   : > { %1025 = vrot.lane.b32.xlu2 %v983_v39, %s1545_s18 }
 0x181   : > { %v795_v41 = vpop.f32.mrf.mxu2 }
 0x182   : > { %v796_v43 = vadd.f32 %v1845_v63, %v795_v41 }
 0x184   : > { %v968_v44 = vadd.f32 %v935_v40, %v796_v43 }
 0x186   : > { %v984_v45 = vmax.f32 %v968_v44, 0.0 }
 0x188   : > { %1031 = vrot.lane.b32.xlu0 %v984_v45, %s1546_s23 }
 0x189   : > { %v798_v47 = vpop.f32.mrf.mxu2 }
 0x18a   : > { %v799_v48 = vadd.f32 %v1845_v63, %v798_v47 }
 0x18c   : > { %v969_v50 = vadd.f32 %v938_v46, %v799_v48 }
 0x18e   : > { %v985_v51 = vmax.f32 %v969_v50, 0.0 }
 0x190   : > { %1037 = vrot.lane.b32.xlu1 %v985_v51, %s1547_s21  ;;  %s1097_s21 = scalar_lea.hbm %s1956_s9, %s1325_s28 }
 0x191   : > { %v801_v53 = vpop.f32.mrf.mxu2 }
 0x192   : > { %v802_v54 = vadd.f32 %v1845_v63, %v801_v53 }
 0x194   : > { %v970_v55 = vadd.f32 %v941_v52, %v802_v54 }
 0x196   : > { %v986_v57 = vmax.f32 %v970_v55, 0.0 }
 0x198   : > { %1043 = vrot.lane.b32.xlu2 %v986_v57, %s1548_s15  ;;  %s1099_s15 = sshll.u32 %s1853_s29, 4  ;;  %s1100_s15 = int_to_ptr.vmem [resolvable:$true] %s1099_s15 }
 0x199   : > { %v804_v59 = vpop.f32.mrf.mxu2 }
 0x19a   : > { %v805_v60 = vadd.f32 %v1845_v63, %v804_v59 }
 0x19c   : > { %v971_v62 = vadd.f32 %v944_v58, %v805_v60 }
 0x19e   : > { %v987_v30 = vmax.f32 %v971_v62, 0.0 }
 0x1a0   : > { %1049 = vrot.lane.b32.xlu0 %v987_v30, %s1549_s24  ;;  %s1101_s24 = sshll.u32 %s1097_s21, 4  ;;  %s1102_s24 = int_to_ptr.hbm [resolvable:$true] %s1101_s24 }
 0x1a1   : > { %v807_v2 = vpop.f32.mrf.mxu2  ;;  %s1458_s13 = sshra.s32 %s1102_s24, 4  ;;  %s1459_s13 = int_to_ptr.hbm [resolvable:$true] %s1458_s13 }
 0x1a2   : > { %v808_v3 = vadd.f32 %v1845_v63, %v807_v2  ;;  %p1465_p4 = scmp.lt.s32.totalorder %s1459_s13, %s1956_s9 }
 0x1a4   : > { %v972_v4 = vadd.f32 %v947_v1, %v808_v3 }
 0x1a6   : > { %v988_v5 = vmax.f32 %v972_v4, 0.0 }
 0x1a8   : > { %1055 = vrot.lane.b32.xlu1 %v988_v5, %s1550_s25  ;;  %s1460_s25 = scalar_lea.hbm %s1459_s13, 8 }
 0x1a9   : > { %v810_v7 = vpop.f32.mrf.mxu2  ;;  %p1461_p0 = scmp.ne.s32.totalorder %s1459_s13, %s1460_s25 }
 0x1aa   : > { %v811_v9 = vadd.f32 %v1845_v63, %v810_v7 }
 0x1ab   : > { %p1462_p1 = pnand %p1461_p0, %p1656_p3 }
 0x1ac   : > { %v973_v10 = vadd.f32 %v950_v6, %v811_v9 }
 0x1ad   : > { %p1463_p2 = pneg %p1462_p1 }
 0x1ae   : > { %v989_v11 = vmax.f32 %v973_v10, 0.0 }
 0x1b0   : > { %1061 = vrot.lane.b32.xlu2 %v989_v11, %s1551_s26 }
 0x1b1   : > { %v813_v13 = vpop.f32.mrf.mxu2 }
 0x1b2   : > { %v814_v14 = vadd.f32 %v1845_v63, %v813_v13 }
 0x1b4   : > { %v974_v16 = vadd.f32 %v953_v12, %v814_v14 }
 0x1b6   : > { %v990_v17 = vmax.f32 %v974_v16, 0.0 }
 0x1b8   : > { %1067 = vrot.lane.b32.xlu0 %v990_v17, %s1552_s20 }
 0x1b9   : > { %v816_v19 = vpop.f32.mrf.mxu2 }
 0x1ba   : > { %v817_v20 = vadd.f32 %v1845_v63, %v816_v19 }
 0x1bc   : > { %v975_v21 = vadd.f32 %v956_v18, %v817_v20 }
 0x1be   : > { %v991_v23 = vmax.f32 %v975_v21, 0.0 }
 0x1c0   : > { %1073 = vrot.lane.b32.xlu1 %v991_v23, %s1553_s17  ;;  %s1464_s17 = scalar_lea.hbm %s1956_s9, 32 }
 0x1c1   : > { %v819_v25 = vpop.f32.mrf.mxu2  ;;  %p1466_p5 = scmp.lt.s32.totalorder %s1464_s17, %s1460_s25 }
 0x1c2   : > { %v820_v26 = vadd.f32 %v1845_v63, %v819_v25 }
 0x1c3   : > { %p1467_p6 = por %p1466_p5, %p1465_p4 }
 0x1c4   : > { %v976_v27 = vadd.f32 %v959_v24, %v820_v26 }
 0x1c5   : > { %p1468_p7 = pnand %p1467_p6, %p1463_p2 }
 0x1c6   : > { %v992_v28 = vmax.f32 %v976_v27, 0.0 }
 0x1c8   : > { %1079 = vrot.lane.b32.xlu2 %v992_v28, %s1554_s11 }
 0x1ca   : > { %v996_v29 = vpop.permute.xlu0 %995 }
 0x1cb   : > { %999 = vst.msk [vmem:[%s1853_s29] sm:$0xff] %vm998_vm4, %v996_v29 }
 0x1d2   : > { %v1002_v31 = vpop.permute.xlu0 %1001  ;;  %v1020_v61 = vpop.permute.xlu2 %1019 }
 0x1d3   : > { %1005 = vst.msk [vmem:[%s1853_s29] sm:$0xff] %vm1004_vm5, %v1002_v31 }
 0x1da   : > { %v1008_v32 = vpop.permute.xlu1 %1007  ;;  %v1026_v33 = vpop.permute.xlu2 %1025 }
 0x1db   : > { %1011 = vst.msk [vmem:[%s1853_s29] sm:$0xff] %vm1010_vm6, %v1008_v32 }
 0x1e2   : > { %v1014_v63 = vpop.permute.xlu1 %1013 }
 0x1e3   : > { %1017 = vst.msk [vmem:[%s1853_s29] sm:$0xff] %vm1016_vm7, %v1014_v63 }
 0x1e4   : > { %1023 = vst.msk [vmem:[%s1853_s29] sm:$0xff] %vm1022_vm8, %v1020_v61 }
 0x1e5   : > { %1029 = vst.msk [vmem:[%s1853_s29] sm:$0xff] %vm1028_vm9, %v1026_v33 }
 0x1f2   : > { %v1044_v36 = vpop.permute.xlu2 %1043 }
 0x1fa   : > { %v1032_v34 = vpop.permute.xlu0 %1031 }
 0x1fb   : > { %1035 = vst.msk [vmem:[%s1853_s29] sm:$0xff] %vm1034_vm10, %v1032_v34 }
 0x202   : > { %v1038_v35 = vpop.permute.xlu1 %1037 }
 0x203   : > { %1041 = vst.msk [vmem:[%s1853_s29] sm:$0xff] %vm1040_vm11, %v1038_v35 }
 0x204   : > { %1047 = vst.msk [vmem:[%s1853_s29] sm:$0xff] %vm1046_vm12, %v1044_v36 }
 0x20a   : > { %v1062_v39 = vpop.permute.xlu2 %1061 }
 0x212   : > { %v1050_v37 = vpop.permute.xlu0 %1049 }
 0x213   : > { %1053 = vst.msk [vmem:[%s1853_s29] sm:$0xff] %vm1052_vm13, %v1050_v37 }
 0x21a   : > { %v1056_v38 = vpop.permute.xlu1 %1055 }
 0x21b   : > { %1059 = vst.msk [vmem:[%s1853_s29] sm:$0xff] %vm1058_vm14, %v1056_v38 }
 0x21c   : > { %1065 = vst.msk [vmem:[%s1853_s29] sm:$0xff] %vm1064_vm15, %v1062_v39 }
 0x222   : > { %v1080_v42 = vpop.permute.xlu2 %1079 }
 0x22a   : > { %v1068_v40 = vpop.permute.xlu0 %1067 }
 0x22b   : > { %1071 = vst.msk [vmem:[%s1853_s29] sm:$0xff] %vm1070_vm0, %v1068_v40 }
 0x232   : > { %v1074_v41 = vpop.permute.xlu1 %1073 }
 0x233   : > { %1077 = vst.msk [vmem:[%s1853_s29] sm:$0xff] %vm1076_vm1, %v1074_v41 }
 0x234   : > { %1083 = vst.msk [vmem:[%s1853_s29] sm:$0xff] %vm1082_vm2, %v1080_v42 }
 0x235   : > { %1471 = shalt.err (!%p1468_p7)
}
 0x236   : > { %1346 = dma.vmem_to_hbm [thread:$0]  (%p1656_p3), %s1100_s15, 128, %s1102_s24, %s1085_s12  }
 0x237 PF: > { %p1352_p9 = scmp.ge.s32.totalorder %s1538_s16, 2  ;;  %s1113_s29 = sand.u32 1, %s1510_s30  }
 0x238   : > { %s1114_s14 = scalar_lea.sflag [#allocation3], %s1113_s29 }
 0x239   : > { %p1349_p10 = pnand %p1352_p9, %p1665_p8 }
 0x23b   : > { %p1350_p11 = pneg %p1349_p10 }
 0x23d   : > { %1505 = dma.done.wait (%p1350_p11), %s1114_s14, 128  }
 0x23e   : > { %1507 = vsyncadd (%p1350_p11), %s1114_s14, 4294967168  ;;  %s22_s16 = sadd.s32 1, %s1538_s16   ;;  %s1973_s28 = sld [smem:[#allocation5_spill]] }
 0x23f   : > { %p19_p12 = scmp.ge.s32.totalorder %s22_s16, 6   ;;  %s1974_s11 = sld [smem:[#allocation11_spill]] }
 0x240   : > { %s1975_s12 = sld [smem:[#allocation6_spill]]  ;;  %s1979_s30 = smov %s1514_s10 }
 0x241   : > { %s1976_s13 = sld [smem:[#allocation7_spill]]  ;;  %21 = sbr.rel (!%p19_p12) target bundleno = 5 (0x5), region = 97 }
 0x242   : > { %s1977_s14 = sld [smem:[#allocation8_spill]] }
 0x243   : > { %s1978_s15 = sld [smem:[#allocation9_spill]] }
 0x244   : > { %s1980_s10 = smov %s1973_s28 }
 0x246   :  { %1120 = vsyncpa [#allocation3], 1 }
 0x247   :  { %1122 = vsyncpa [#allocation3 + $0x1], 1 }

</bundles_post_ra>
